<compile_context>
chip_gen: v7x
topology: tpu7x:2x2x1
jax: 0.10.0
libtpu: 0.0.40
codegen_flags: <defaults>
</compile_context>

<pallas_src>
import math

import jax
import jax.numpy as jnp
from jax.experimental import pallas as pl
from jax.experimental.pallas import tpu as pltpu

HIDDEN_DIM = 32
NUM_HEADS = 4
MLP_SIZE = 64
SEQ_LEN = 8
BATCH = 2
LN_EPS = 1e-5
HEAD_DIM = HIDDEN_DIM // NUM_HEADS


def _layer_norm(v, g, b):
    mu = jnp.mean(v, axis=-1, keepdims=True)
    var = jnp.mean((v - mu) ** 2, axis=-1, keepdims=True)
    return (v - mu) * jax.lax.rsqrt(var + LN_EPS) * g + b


def _gelu_exact(x):
    # nn.GELU default: exact erf formulation.
    return 0.5 * x * (1.0 + jax.lax.erf(x * (1.0 / math.sqrt(2.0))))


def encoder_layer_kernel(
    x_ref,                      # (B*S, D)   tokens, batch-major
    g1_ref, b1_ref,             # (1, D)     pre_norm gamma/beta
    wqkv_t_ref, bqkv_ref,       # (D, 3D), (1, 3D)   q-part pre-scaled by 1/sqrt(dh)
    wo_t_ref, bo_ref,           # (D, D), (1, D)     out_proj
    g2_ref, b2_ref,             # (1, D)     post_norm gamma/beta
    w1_t_ref, bm1_ref,          # (D, M), (1, M)     mlp.fc1
    w2_t_ref, bm2_ref,          # (M, D), (1, D)     mlp.fc2
    o_ref,                      # (B*S, D)
):
    x = x_ref[...]                                    # (B*S, D) fp32
    D = HIDDEN_DIM
    dh = HEAD_DIM

    # ---- pre-norm ----
    xn = _layer_norm(x, g1_ref[...], b1_ref[...])

    # ---- multi-head self attention ----
    # qkv projection: (B*S, D) @ (D, 3D) + (1, 3D); q columns already scaled.
    qkv = jnp.dot(xn, wqkv_t_ref[...], preferred_element_type=jnp.float32) + bqkv_ref[...]
    q = qkv[:, 0 * D:1 * D]
    k = qkv[:, 1 * D:2 * D]
    v = qkv[:, 2 * D:3 * D]

    head_outs = []
    for h in range(NUM_HEADS):
        lo, hi = h * dh, (h + 1) * dh
        # (B*S, dh) -> (B, S, dh): tile-aligned leading-dim split (no relayout).
        qh = q[:, lo:hi].reshape(BATCH, SEQ_LEN, dh)
        kh = k[:, lo:hi].reshape(BATCH, SEQ_LEN, dh)
        vh = v[:, lo:hi].reshape(BATCH, SEQ_LEN, dh)
        s = jnp.einsum("bqd,bkd->bqk", qh, kh,
                       preferred_element_type=jnp.float32)       # (B, S, S)
        s = s - jnp.max(s, axis=-1, keepdims=True)
        p = jnp.exp(s)
        p = p * pl.reciprocal(jnp.sum(p, axis=-1, keepdims=True), approx=True)
        oh = jnp.einsum("bqk,bkd->bqd", p, vh,
                        preferred_element_type=jnp.float32)      # (B, S, dh)
        head_outs.append(oh.reshape(BATCH * SEQ_LEN, dh))
    attn = jnp.concatenate(head_outs, axis=-1)                   # (B*S, D)
    attn = jnp.dot(attn, wo_t_ref[...], preferred_element_type=jnp.float32) + bo_ref[...]

    x_attn = attn + x                                            # residual 1

    # ---- post-norm + MLP (dropout = identity in eval mode) ----
    xn2 = _layer_norm(x_attn, g2_ref[...], b2_ref[...])
    h1 = jnp.dot(xn2, w1_t_ref[...], preferred_element_type=jnp.float32) + bm1_ref[...]
    h1 = _gelu_exact(h1)
    y = jnp.dot(h1, w2_t_ref[...], preferred_element_type=jnp.float32) + bm2_ref[...]

    o_ref[...] = (y + x_attn).astype(o_ref.dtype)                # residual 2


def encoder_layer(x_sbd, params):
    """x_sbd: (S, B, D) float32 (PyTorch MHA layout). Returns (S, B, D)."""
    S, B, D = x_sbd.shape
    M = params["w1"].shape[0]
    dh = D // NUM_HEADS
    scale = 1.0 / math.sqrt(dh)

    # Flatten tokens batch-major (tiny 2 KB layout op, stays outside the kernel).
    x2 = jnp.transpose(x_sbd, (1, 0, 2)).reshape(B * S, D)

    # Pre-transpose weights once so the kernel never transposes; fold the
    # softmax scale into the q-projection columns (and q bias).
    q_scale = jnp.concatenate(
        [jnp.full((D,), scale, jnp.float32), jnp.ones((2 * D,), jnp.float32)]
    )
    wqkv_t = params["wqkv"].T * q_scale[None, :]          # (D, 3D)
    bqkv = params["bqkv"] * q_scale[None, :]              # (1, 3D)
    wo_t = params["wo"].T                                 # (D, D)
    w1_t = params["w1"].T                                 # (D, M)
    w2_t = params["w2"].T                                 # (M, D)

    weights = [
        params["g1"], params["b1"],
        wqkv_t, bqkv,
        wo_t, params["bo"],
        params["g2"], params["b2"],
        w1_t, params["bm1"],
        w2_t, params["bm2"],
    ]

    flops = (
        2 * B * S * (D * 3 * D + D * D + 2 * D * M)        # projections + MLP
        + 2 * 2 * B * NUM_HEADS * S * S * dh               # QK^T and PV
    )
    transcendentals = B * S * M + B * NUM_HEADS * S * S    # erf + exp
    bytes_accessed = 4 * (2 * B * S * D + sum(int(w.size) for w in weights))

    vmem_spec = pl.BlockSpec(memory_space=pltpu.MemorySpace.VMEM)
    out = pl.pallas_call(
        encoder_layer_kernel,
        out_shape=jax.ShapeDtypeStruct((B * S, D), x2.dtype),
        in_specs=[vmem_spec] * (1 + len(weights)),
        out_specs=vmem_spec,
        cost_estimate=pl.CostEstimate(
            flops=flops,
            transcendentals=transcendentals,
            bytes_accessed=bytes_accessed,
        ),
    )(x2, *weights)

    return jnp.transpose(out.reshape(B, S, D), (1, 0, 2))  # back to (S, B, D)


def reference_encoder_layer(x_sbd, params):
    """Pure-JAX reference mirroring the PyTorch module (eval mode), exact math."""
    x = jnp.transpose(x_sbd, (1, 0, 2))          # (B, S, D)
    D = x.shape[-1]
    dh = D // NUM_HEADS

    def ln(v, g, b):
        mu = jnp.mean(v, -1, keepdims=True)
        var = jnp.mean((v - mu) ** 2, -1, keepdims=True)
        return (v - mu) / jnp.sqrt(var + LN_EPS) * g + b

    xn = ln(x, params["g1"][0], params["b1"][0])
    qkv = jnp.einsum("bsd,ed->bse", xn, params["wqkv"]) + params["bqkv"][0]
    q, k, v = jnp.split(qkv, 3, axis=-1)
    q = q.reshape(q.shape[0], q.shape[1], NUM_HEADS, dh)
    k = k.reshape(*q.shape)
    v = v.reshape(*q.shape)
    s = jnp.einsum("bqhd,bkhd->bhqk", q, k) / math.sqrt(dh)
    p = jax.nn.softmax(s, axis=-1)
    a = jnp.einsum("bhqk,bkhd->bqhd", p, v).reshape(x.shape)
    a = jnp.einsum("bsd,ed->bse", a, params["wo"]) + params["bo"][0]
    x_attn = a + x
    xn2 = ln(x_attn, params["g2"][0], params["b2"][0])
    h1 = jnp.einsum("bsd,md->bsm", xn2, params["w1"]) + params["bm1"][0]
    h1 = 0.5 * h1 * (1.0 + jax.lax.erf(h1 / math.sqrt(2.0)))
    y = jnp.einsum("bsm,dm->bsd", h1, params["w2"]) + params["bm2"][0]
    return jnp.transpose(y + x_attn, (1, 0, 2))


def init_params(key, hidden_dim=HIDDEN_DIM, mlp_size=MLP_SIZE):
    ks = jax.random.split(key, 8)
    std = 0.02
    return {
        "g1": jnp.ones((1, hidden_dim), jnp.float32),
        "b1": jnp.zeros((1, hidden_dim), jnp.float32),
        "wqkv": std * jax.random.normal(ks[0], (3 * hidden_dim, hidden_dim), jnp.float32),
        "bqkv": std * jax.random.normal(ks[1], (1, 3 * hidden_dim), jnp.float32),
        "wo": std * jax.random.normal(ks[2], (hidden_dim, hidden_dim), jnp.float32),
        "bo": std * jax.random.normal(ks[3], (1, hidden_dim), jnp.float32),
        "g2": jnp.ones((1, hidden_dim), jnp.float32),
        "b2": jnp.zeros((1, hidden_dim), jnp.float32),
        "w1": std * jax.random.normal(ks[4], (mlp_size, hidden_dim), jnp.float32),
        "bm1": std * jax.random.normal(ks[5], (1, mlp_size), jnp.float32),
        "w2": std * jax.random.normal(ks[6], (hidden_dim, mlp_size), jnp.float32),
        "bm2": std * jax.random.normal(ks[7], (1, hidden_dim), jnp.float32),
    }


if __name__ == "__main__":
    key = jax.random.PRNGKey(0)
    kx, kp = jax.random.split(key)
    x = jax.random.normal(kx, (SEQ_LEN, BATCH, HIDDEN_DIM), jnp.float32)  # (S, B, D)
    params = init_params(kp)

    out = encoder_layer(x, params)
    out = jax.block_until_ready(out)

    ref = reference_encoder_layer(x, params)
    assert out.shape == (SEQ_LEN, BATCH, HIDDEN_DIM)
    # Tolerance budgets for the approx=True EUP reciprocal (~1e-3-level relative
    # error) used in the softmax denominator; everything else is exact f32.
    assert jnp.allclose(out, ref, atol=5e-4, rtol=5e-4), "mismatch vs reference"

    print("KERNEL_OK")
</pallas_src>

<mosaic_0001>
module attributes {stable_mosaic.version = 11 : i64} {
  func.func @encoder_layer_kernel(%arg0: memref<16x32xf32, #tpu.memory_space<vmem>>, %arg1: memref<1x32xf32, #tpu.memory_space<vmem>>, %arg2: memref<1x32xf32, #tpu.memory_space<vmem>>, %arg3: memref<32x96xf32, #tpu.memory_space<vmem>>, %arg4: memref<1x96xf32, #tpu.memory_space<vmem>>, %arg5: memref<32x32xf32, #tpu.memory_space<vmem>>, %arg6: memref<1x32xf32, #tpu.memory_space<vmem>>, %arg7: memref<1x32xf32, #tpu.memory_space<vmem>>, %arg8: memref<1x32xf32, #tpu.memory_space<vmem>>, %arg9: memref<32x64xf32, #tpu.memory_space<vmem>>, %arg10: memref<1x64xf32, #tpu.memory_space<vmem>>, %arg11: memref<64x32xf32, #tpu.memory_space<vmem>>, %arg12: memref<1x32xf32, #tpu.memory_space<vmem>>, %arg13: memref<16x32xf32, #tpu.memory_space<vmem>>) attributes {dimension_semantics = [], scalar_prefetch = 0 : i64, scratch_operands = 0 : i64, tpu.core_type = #tpu.core_type<tc>} {
    %c0 = arith.constant 0 : index
    %c0_0 = arith.constant 0 : index
    %0 = vector.load %arg0[%c0, %c0_0] : memref<16x32xf32, #tpu.memory_space<vmem>>, vector<16x32xf32>
    %c0_1 = arith.constant 0 : index
    %c0_2 = arith.constant 0 : index
    %1 = vector.load %arg1[%c0_1, %c0_2] : memref<1x32xf32, #tpu.memory_space<vmem>>, vector<1x32xf32>
    %c0_3 = arith.constant 0 : index
    %c0_4 = arith.constant 0 : index
    %2 = vector.load %arg2[%c0_3, %c0_4] : memref<1x32xf32, #tpu.memory_space<vmem>>, vector<1x32xf32>
    %cst = arith.constant dense<0.000000e+00> : vector<16xf32>
    %3 = vector.multi_reduction <add>, %0, %cst [1] : vector<16x32xf32> to vector<16xf32>
    %4 = vector.shape_cast %3 : vector<16xf32> to vector<16x1xf32>
    %cst_5 = arith.constant 3.200000e+01 : f32
    %5 = vector.broadcast %cst_5 : f32 to vector<16x1xf32>
    %6 = arith.divf %4, %5 : vector<16x1xf32>
    %7 = vector.broadcast %6 : vector<16x1xf32> to vector<16x32xf32>
    %8 = arith.subf %0, %7 : vector<16x32xf32>
    %9 = arith.mulf %8, %8 : vector<16x32xf32>
    %cst_6 = arith.constant dense<0.000000e+00> : vector<16xf32>
    %10 = vector.multi_reduction <add>, %9, %cst_6 [1] : vector<16x32xf32> to vector<16xf32>
    %11 = vector.shape_cast %10 : vector<16xf32> to vector<16x1xf32>
    %cst_7 = arith.constant 3.200000e+01 : f32
    %12 = vector.broadcast %cst_7 : f32 to vector<16x1xf32>
    %13 = arith.divf %11, %12 : vector<16x1xf32>
    %14 = vector.broadcast %6 : vector<16x1xf32> to vector<16x32xf32>
    %15 = arith.subf %0, %14 : vector<16x32xf32>
    %cst_8 = arith.constant 9.99999974E-6 : f32
    %16 = vector.broadcast %cst_8 : f32 to vector<16x1xf32>
    %17 = arith.addf %13, %16 : vector<16x1xf32>
    %18 = math.rsqrt %17 : vector<16x1xf32>
    %19 = vector.broadcast %18 : vector<16x1xf32> to vector<16x32xf32>
    %20 = arith.mulf %15, %19 : vector<16x32xf32>
    %21 = vector.broadcast %1 : vector<1x32xf32> to vector<16x32xf32>
    %22 = arith.mulf %20, %21 : vector<16x32xf32>
    %23 = vector.broadcast %2 : vector<1x32xf32> to vector<16x32xf32>
    %24 = arith.addf %22, %23 : vector<16x32xf32>
    %c0_9 = arith.constant 0 : index
    %c0_10 = arith.constant 0 : index
    %25 = vector.load %arg3[%c0_9, %c0_10] : memref<32x96xf32, #tpu.memory_space<vmem>>, vector<32x96xf32>
    %cst_11 = arith.constant dense<0.000000e+00> : vector<16x96xf32>
    %26 = tpu.matmul %24, %25, %cst_11 {dimension_numbers = #tpu.dot_dimension_numbers<[1], [0], [0], [1], [0, 0, 1, 1], [], []>} : vector<16x32xf32>, vector<32x96xf32>, vector<16x96xf32> -> vector<16x96xf32>
    %c0_12 = arith.constant 0 : index
    %c0_13 = arith.constant 0 : index
    %27 = vector.load %arg4[%c0_12, %c0_13] : memref<1x96xf32, #tpu.memory_space<vmem>>, vector<1x96xf32>
    %28 = vector.broadcast %27 : vector<1x96xf32> to vector<16x96xf32>
    %29 = arith.addf %26, %28 : vector<16x96xf32>
    %30 = vector.extract_strided_slice %29 {offsets = [0, 0], sizes = [16, 32], strides = [1, 1]} : vector<16x96xf32> to vector<16x32xf32>
    %31 = vector.extract_strided_slice %29 {offsets = [0, 32], sizes = [16, 32], strides = [1, 1]} : vector<16x96xf32> to vector<16x32xf32>
    %32 = vector.extract_strided_slice %29 {offsets = [0, 64], sizes = [16, 32], strides = [1, 1]} : vector<16x96xf32> to vector<16x32xf32>
    %33 = vector.extract_strided_slice %30 {offsets = [0, 0], sizes = [16, 8], strides = [1, 1]} : vector<16x32xf32> to vector<16x8xf32>
    %34 = vector.shape_cast %33 : vector<16x8xf32> to vector<2x8x8xf32>
    %35 = vector.extract_strided_slice %31 {offsets = [0, 0], sizes = [16, 8], strides = [1, 1]} : vector<16x32xf32> to vector<16x8xf32>
    %36 = vector.shape_cast %35 : vector<16x8xf32> to vector<2x8x8xf32>
    %37 = vector.extract_strided_slice %32 {offsets = [0, 0], sizes = [16, 8], strides = [1, 1]} : vector<16x32xf32> to vector<16x8xf32>
    %38 = vector.shape_cast %37 : vector<16x8xf32> to vector<2x8x8xf32>
    "tpu.trace_start"() <{level = 10 : i32, message = "bqd,bkd->bqk"}> : () -> ()
    %cst_14 = arith.constant dense<0.000000e+00> : vector<2x8x8xf32>
    %39 = tpu.matmul %34, %36, %cst_14 {dimension_numbers = #tpu.dot_dimension_numbers<[2], [2], [1], [1], [0, 0, 0, 1, 1, 1], [0], [0]>} : vector<2x8x8xf32>, vector<2x8x8xf32>, vector<2x8x8xf32> -> vector<2x8x8xf32>
    "tpu.trace_stop"() : () -> ()
    %cst_15 = arith.constant dense<0xFF800000> : vector<2x8xf32>
    %40 = vector.multi_reduction <maximumf>, %39, %cst_15 [2] : vector<2x8x8xf32> to vector<2x8xf32>
    %41 = vector.shape_cast %40 : vector<2x8xf32> to vector<2x8x1xf32>
    %42 = vector.broadcast %41 : vector<2x8x1xf32> to vector<2x8x8xf32>
    %43 = arith.subf %39, %42 : vector<2x8x8xf32>
    %44 = math.exp %43 : vector<2x8x8xf32>
    %cst_16 = arith.constant dense<0.000000e+00> : vector<2x8xf32>
    %45 = vector.multi_reduction <add>, %44, %cst_16 [2] : vector<2x8x8xf32> to vector<2x8xf32>
    %46 = vector.shape_cast %45 : vector<2x8xf32> to vector<2x8x1xf32>
    %47 = tpu.reciprocal %46 {approx = true} : vector<2x8x1xf32> -> vector<2x8x1xf32>
    %48 = vector.broadcast %47 : vector<2x8x1xf32> to vector<2x8x8xf32>
    %49 = arith.mulf %44, %48 : vector<2x8x8xf32>
    "tpu.trace_start"() <{level = 10 : i32, message = "bqk,bkd->bqd"}> : () -> ()
    %cst_17 = arith.constant dense<0.000000e+00> : vector<2x8x8xf32>
    %50 = tpu.matmul %49, %38, %cst_17 {dimension_numbers = #tpu.dot_dimension_numbers<[2], [1], [1], [2], [0, 0, 0, 1, 1, 2], [0], [0]>} : vector<2x8x8xf32>, vector<2x8x8xf32>, vector<2x8x8xf32> -> vector<2x8x8xf32>
    "tpu.trace_stop"() : () -> ()
    %51 = vector.shape_cast %50 : vector<2x8x8xf32> to vector<16x8xf32>
    %52 = vector.extract_strided_slice %30 {offsets = [0, 8], sizes = [16, 8], strides = [1, 1]} : vector<16x32xf32> to vector<16x8xf32>
    %53 = vector.shape_cast %52 : vector<16x8xf32> to vector<2x8x8xf32>
    %54 = vector.extract_strided_slice %31 {offsets = [0, 8], sizes = [16, 8], strides = [1, 1]} : vector<16x32xf32> to vector<16x8xf32>
    %55 = vector.shape_cast %54 : vector<16x8xf32> to vector<2x8x8xf32>
    %56 = vector.extract_strided_slice %32 {offsets = [0, 8], sizes = [16, 8], strides = [1, 1]} : vector<16x32xf32> to vector<16x8xf32>
    %57 = vector.shape_cast %56 : vector<16x8xf32> to vector<2x8x8xf32>
    "tpu.trace_start"() <{level = 10 : i32, message = "bqd,bkd->bqk"}> : () -> ()
    %cst_18 = arith.constant dense<0.000000e+00> : vector<2x8x8xf32>
    %58 = tpu.matmul %53, %55, %cst_18 {dimension_numbers = #tpu.dot_dimension_numbers<[2], [2], [1], [1], [0, 0, 0, 1, 1, 1], [0], [0]>} : vector<2x8x8xf32>, vector<2x8x8xf32>, vector<2x8x8xf32> -> vector<2x8x8xf32>
    "tpu.trace_stop"() : () -> ()
    %cst_19 = arith.constant dense<0xFF800000> : vector<2x8xf32>
    %59 = vector.multi_reduction <maximumf>, %58, %cst_19 [2] : vector<2x8x8xf32> to vector<2x8xf32>
    %60 = vector.shape_cast %59 : vector<2x8xf32> to vector<2x8x1xf32>
    %61 = vector.broadcast %60 : vector<2x8x1xf32> to vector<2x8x8xf32>
    %62 = arith.subf %58, %61 : vector<2x8x8xf32>
    %63 = math.exp %62 : vector<2x8x8xf32>
    %cst_20 = arith.constant dense<0.000000e+00> : vector<2x8xf32>
    %64 = vector.multi_reduction <add>, %63, %cst_20 [2] : vector<2x8x8xf32> to vector<2x8xf32>
    %65 = vector.shape_cast %64 : vector<2x8xf32> to vector<2x8x1xf32>
    %66 = tpu.reciprocal %65 {approx = true} : vector<2x8x1xf32> -> vector<2x8x1xf32>
    %67 = vector.broadcast %66 : vector<2x8x1xf32> to vector<2x8x8xf32>
    %68 = arith.mulf %63, %67 : vector<2x8x8xf32>
    "tpu.trace_start"() <{level = 10 : i32, message = "bqk,bkd->bqd"}> : () -> ()
    %cst_21 = arith.constant dense<0.000000e+00> : vector<2x8x8xf32>
    %69 = tpu.matmul %68, %57, %cst_21 {dimension_numbers = #tpu.dot_dimension_numbers<[2], [1], [1], [2], [0, 0, 0, 1, 1, 2], [0], [0]>} : vector<2x8x8xf32>, vector<2x8x8xf32>, vector<2x8x8xf32> -> vector<2x8x8xf32>
    "tpu.trace_stop"() : () -> ()
    %70 = vector.shape_cast %69 : vector<2x8x8xf32> to vector<16x8xf32>
    %71 = vector.extract_strided_slice %30 {offsets = [0, 16], sizes = [16, 8], strides = [1, 1]} : vector<16x32xf32> to vector<16x8xf32>
    %72 = vector.shape_cast %71 : vector<16x8xf32> to vector<2x8x8xf32>
    %73 = vector.extract_strided_slice %31 {offsets = [0, 16], sizes = [16, 8], strides = [1, 1]} : vector<16x32xf32> to vector<16x8xf32>
    %74 = vector.shape_cast %73 : vector<16x8xf32> to vector<2x8x8xf32>
    %75 = vector.extract_strided_slice %32 {offsets = [0, 16], sizes = [16, 8], strides = [1, 1]} : vector<16x32xf32> to vector<16x8xf32>
    %76 = vector.shape_cast %75 : vector<16x8xf32> to vector<2x8x8xf32>
    "tpu.trace_start"() <{level = 10 : i32, message = "bqd,bkd->bqk"}> : () -> ()
    %cst_22 = arith.constant dense<0.000000e+00> : vector<2x8x8xf32>
    %77 = tpu.matmul %72, %74, %cst_22 {dimension_numbers = #tpu.dot_dimension_numbers<[2], [2], [1], [1], [0, 0, 0, 1, 1, 1], [0], [0]>} : vector<2x8x8xf32>, vector<2x8x8xf32>, vector<2x8x8xf32> -> vector<2x8x8xf32>
    "tpu.trace_stop"() : () -> ()
    %cst_23 = arith.constant dense<0xFF800000> : vector<2x8xf32>
    %78 = vector.multi_reduction <maximumf>, %77, %cst_23 [2] : vector<2x8x8xf32> to vector<2x8xf32>
    %79 = vector.shape_cast %78 : vector<2x8xf32> to vector<2x8x1xf32>
    %80 = vector.broadcast %79 : vector<2x8x1xf32> to vector<2x8x8xf32>
    %81 = arith.subf %77, %80 : vector<2x8x8xf32>
    %82 = math.exp %81 : vector<2x8x8xf32>
    %cst_24 = arith.constant dense<0.000000e+00> : vector<2x8xf32>
    %83 = vector.multi_reduction <add>, %82, %cst_24 [2] : vector<2x8x8xf32> to vector<2x8xf32>
    %84 = vector.shape_cast %83 : vector<2x8xf32> to vector<2x8x1xf32>
    %85 = tpu.reciprocal %84 {approx = true} : vector<2x8x1xf32> -> vector<2x8x1xf32>
    %86 = vector.broadcast %85 : vector<2x8x1xf32> to vector<2x8x8xf32>
    %87 = arith.mulf %82, %86 : vector<2x8x8xf32>
    "tpu.trace_start"() <{level = 10 : i32, message = "bqk,bkd->bqd"}> : () -> ()
    %cst_25 = arith.constant dense<0.000000e+00> : vector<2x8x8xf32>
    %88 = tpu.matmul %87, %76, %cst_25 {dimension_numbers = #tpu.dot_dimension_numbers<[2], [1], [1], [2], [0, 0, 0, 1, 1, 2], [0], [0]>} : vector<2x8x8xf32>, vector<2x8x8xf32>, vector<2x8x8xf32> -> vector<2x8x8xf32>
    "tpu.trace_stop"() : () -> ()
    %89 = vector.shape_cast %88 : vector<2x8x8xf32> to vector<16x8xf32>
    %90 = vector.extract_strided_slice %30 {offsets = [0, 24], sizes = [16, 8], strides = [1, 1]} : vector<16x32xf32> to vector<16x8xf32>
    %91 = vector.shape_cast %90 : vector<16x8xf32> to vector<2x8x8xf32>
    %92 = vector.extract_strided_slice %31 {offsets = [0, 24], sizes = [16, 8], strides = [1, 1]} : vector<16x32xf32> to vector<16x8xf32>
    %93 = vector.shape_cast %92 : vector<16x8xf32> to vector<2x8x8xf32>
    %94 = vector.extract_strided_slice %32 {offsets = [0, 24], sizes = [16, 8], strides = [1, 1]} : vector<16x32xf32> to vector<16x8xf32>
    %95 = vector.shape_cast %94 : vector<16x8xf32> to vector<2x8x8xf32>
    "tpu.trace_start"() <{level = 10 : i32, message = "bqd,bkd->bqk"}> : () -> ()
    %cst_26 = arith.constant dense<0.000000e+00> : vector<2x8x8xf32>
    %96 = tpu.matmul %91, %93, %cst_26 {dimension_numbers = #tpu.dot_dimension_numbers<[2], [2], [1], [1], [0, 0, 0, 1, 1, 1], [0], [0]>} : vector<2x8x8xf32>, vector<2x8x8xf32>, vector<2x8x8xf32> -> vector<2x8x8xf32>
    "tpu.trace_stop"() : () -> ()
    %cst_27 = arith.constant dense<0xFF800000> : vector<2x8xf32>
    %97 = vector.multi_reduction <maximumf>, %96, %cst_27 [2] : vector<2x8x8xf32> to vector<2x8xf32>
    %98 = vector.shape_cast %97 : vector<2x8xf32> to vector<2x8x1xf32>
    %99 = vector.broadcast %98 : vector<2x8x1xf32> to vector<2x8x8xf32>
    %100 = arith.subf %96, %99 : vector<2x8x8xf32>
    %101 = math.exp %100 : vector<2x8x8xf32>
    %cst_28 = arith.constant dense<0.000000e+00> : vector<2x8xf32>
    %102 = vector.multi_reduction <add>, %101, %cst_28 [2] : vector<2x8x8xf32> to vector<2x8xf32>
    %103 = vector.shape_cast %102 : vector<2x8xf32> to vector<2x8x1xf32>
    %104 = tpu.reciprocal %103 {approx = true} : vector<2x8x1xf32> -> vector<2x8x1xf32>
    %105 = vector.broadcast %104 : vector<2x8x1xf32> to vector<2x8x8xf32>
    %106 = arith.mulf %101, %105 : vector<2x8x8xf32>
    "tpu.trace_start"() <{level = 10 : i32, message = "bqk,bkd->bqd"}> : () -> ()
    %cst_29 = arith.constant dense<0.000000e+00> : vector<2x8x8xf32>
    %107 = tpu.matmul %106, %95, %cst_29 {dimension_numbers = #tpu.dot_dimension_numbers<[2], [1], [1], [2], [0, 0, 0, 1, 1, 2], [0], [0]>} : vector<2x8x8xf32>, vector<2x8x8xf32>, vector<2x8x8xf32> -> vector<2x8x8xf32>
    "tpu.trace_stop"() : () -> ()
    %108 = vector.shape_cast %107 : vector<2x8x8xf32> to vector<16x8xf32>
    %109 = tpu.concatenate %51, %70, %89, %108 in 1 : vector<16x8xf32>, vector<16x8xf32>, vector<16x8xf32>, vector<16x8xf32> -> vector<16x32xf32>
    %c0_30 = arith.constant 0 : index
    %c0_31 = arith.constant 0 : index
    %110 = vector.load %arg5[%c0_30, %c0_31] : memref<32x32xf32, #tpu.memory_space<vmem>>, vector<32x32xf32>
    %cst_32 = arith.constant dense<0.000000e+00> : vector<16x32xf32>
    %111 = tpu.matmul %109, %110, %cst_32 {dimension_numbers = #tpu.dot_dimension_numbers<[1], [0], [0], [1], [0, 0, 1, 1], [], []>} : vector<16x32xf32>, vector<32x32xf32>, vector<16x32xf32> -> vector<16x32xf32>
    %c0_33 = arith.constant 0 : index
    %c0_34 = arith.constant 0 : index
    %112 = vector.load %arg6[%c0_33, %c0_34] : memref<1x32xf32, #tpu.memory_space<vmem>>, vector<1x32xf32>
    %113 = vector.broadcast %112 : vector<1x32xf32> to vector<16x32xf32>
    %114 = arith.addf %111, %113 : vector<16x32xf32>
    %115 = arith.addf %114, %0 : vector<16x32xf32>
    %c0_35 = arith.constant 0 : index
    %c0_36 = arith.constant 0 : index
    %116 = vector.load %arg7[%c0_35, %c0_36] : memref<1x32xf32, #tpu.memory_space<vmem>>, vector<1x32xf32>
    %c0_37 = arith.constant 0 : index
    %c0_38 = arith.constant 0 : index
    %117 = vector.load %arg8[%c0_37, %c0_38] : memref<1x32xf32, #tpu.memory_space<vmem>>, vector<1x32xf32>
    %cst_39 = arith.constant dense<0.000000e+00> : vector<16xf32>
    %118 = vector.multi_reduction <add>, %115, %cst_39 [1] : vector<16x32xf32> to vector<16xf32>
    %119 = vector.shape_cast %118 : vector<16xf32> to vector<16x1xf32>
    %cst_40 = arith.constant 3.200000e+01 : f32
    %120 = vector.broadcast %cst_40 : f32 to vector<16x1xf32>
    %121 = arith.divf %119, %120 : vector<16x1xf32>
    %122 = vector.broadcast %121 : vector<16x1xf32> to vector<16x32xf32>
    %123 = arith.subf %115, %122 : vector<16x32xf32>
    %124 = arith.mulf %123, %123 : vector<16x32xf32>
    %cst_41 = arith.constant dense<0.000000e+00> : vector<16xf32>
    %125 = vector.multi_reduction <add>, %124, %cst_41 [1] : vector<16x32xf32> to vector<16xf32>
    %126 = vector.shape_cast %125 : vector<16xf32> to vector<16x1xf32>
    %cst_42 = arith.constant 3.200000e+01 : f32
    %127 = vector.broadcast %cst_42 : f32 to vector<16x1xf32>
    %128 = arith.divf %126, %127 : vector<16x1xf32>
    %129 = vector.broadcast %121 : vector<16x1xf32> to vector<16x32xf32>
    %130 = arith.subf %115, %129 : vector<16x32xf32>
    %cst_43 = arith.constant 9.99999974E-6 : f32
    %131 = vector.broadcast %cst_43 : f32 to vector<16x1xf32>
    %132 = arith.addf %128, %131 : vector<16x1xf32>
    %133 = math.rsqrt %132 : vector<16x1xf32>
    %134 = vector.broadcast %133 : vector<16x1xf32> to vector<16x32xf32>
    %135 = arith.mulf %130, %134 : vector<16x32xf32>
    %136 = vector.broadcast %116 : vector<1x32xf32> to vector<16x32xf32>
    %137 = arith.mulf %135, %136 : vector<16x32xf32>
    %138 = vector.broadcast %117 : vector<1x32xf32> to vector<16x32xf32>
    %139 = arith.addf %137, %138 : vector<16x32xf32>
    %c0_44 = arith.constant 0 : index
    %c0_45 = arith.constant 0 : index
    %140 = vector.load %arg9[%c0_44, %c0_45] : memref<32x64xf32, #tpu.memory_space<vmem>>, vector<32x64xf32>
    %cst_46 = arith.constant dense<0.000000e+00> : vector<16x64xf32>
    %141 = tpu.matmul %139, %140, %cst_46 {dimension_numbers = #tpu.dot_dimension_numbers<[1], [0], [0], [1], [0, 0, 1, 1], [], []>} : vector<16x32xf32>, vector<32x64xf32>, vector<16x64xf32> -> vector<16x64xf32>
    %c0_47 = arith.constant 0 : index
    %c0_48 = arith.constant 0 : index
    %142 = vector.load %arg10[%c0_47, %c0_48] : memref<1x64xf32, #tpu.memory_space<vmem>>, vector<1x64xf32>
    %143 = vector.broadcast %142 : vector<1x64xf32> to vector<16x64xf32>
    %144 = arith.addf %141, %143 : vector<16x64xf32>
    %cst_49 = arith.constant 5.000000e-01 : f32
    %145 = vector.broadcast %cst_49 : f32 to vector<16x64xf32>
    %146 = arith.mulf %145, %144 : vector<16x64xf32>
    %cst_50 = arith.constant 0.707106769 : f32
    %147 = vector.broadcast %cst_50 : f32 to vector<16x64xf32>
    %148 = arith.mulf %144, %147 : vector<16x64xf32>
    %149 = math.erf %148 : vector<16x64xf32>
    %cst_51 = arith.constant 1.000000e+00 : f32
    %150 = vector.broadcast %cst_51 : f32 to vector<16x64xf32>
    %151 = arith.addf %150, %149 : vector<16x64xf32>
    %152 = arith.mulf %146, %151 : vector<16x64xf32>
    %c0_52 = arith.constant 0 : index
    %c0_53 = arith.constant 0 : index
    %153 = vector.load %arg11[%c0_52, %c0_53] : memref<64x32xf32, #tpu.memory_space<vmem>>, vector<64x32xf32>
    %cst_54 = arith.constant dense<0.000000e+00> : vector<16x32xf32>
    %154 = tpu.matmul %152, %153, %cst_54 {dimension_numbers = #tpu.dot_dimension_numbers<[1], [0], [0], [1], [0, 0, 1, 1], [], []>} : vector<16x64xf32>, vector<64x32xf32>, vector<16x32xf32> -> vector<16x32xf32>
    %c0_55 = arith.constant 0 : index
    %c0_56 = arith.constant 0 : index
    %155 = vector.load %arg12[%c0_55, %c0_56] : memref<1x32xf32, #tpu.memory_space<vmem>>, vector<1x32xf32>
    %156 = vector.broadcast %155 : vector<1x32xf32> to vector<16x32xf32>
    %157 = arith.addf %154, %156 : vector<16x32xf32>
    %158 = arith.addf %157, %115 : vector<16x32xf32>
    %c0_57 = arith.constant 0 : index
    %c0_58 = arith.constant 0 : index
    %159 = vector.load %arg13[%c0_57, %c0_58] : memref<16x32xf32, #tpu.memory_space<vmem>>, vector<16x32xf32>
    tpu.vector_store %arg13[%c0_57, %c0_58], %158 {strides = array<i32>} : memref<16x32xf32, #tpu.memory_space<vmem>>, vector<16x32xf32>,
    return
  }
}

</mosaic_0001>

<bundles_post_ra>
// kernel: tpu_custom_call.1
= control target key start
LH: loop header
LB: loop body
LE: loop exit
PB: predicated region body
PF: predicated region fallthrough
CT: control target
= control target key end

     0   :  { %18 = vsyncpa [#allocation3], 0  ;;  %s2662_s0 = inlined_call_operand.hbm [shape: f32[16,32], index: 0, kind: input, shape index: {}]   ;;  %s2663_s1 = inlined_call_operand.vmem [shape: f32[1,32], index: 1, kind: input, shape index: {}]   ;;  %s2664_s2 = inlined_call_operand.vmem [shape: f32[1,32], index: 2, kind: input, shape index: {}]   ;;  %s2665_s3 = inlined_call_operand.vmem [shape: f32[32,96], index: 3, kind: input, shape index: {}]   ;;  %s2666_s4 = inlined_call_operand.vmem [shape: f32[1,96], index: 4, kind: input, shape index: {}]   ;;  %s2667_s5 = inlined_call_operand.vmem [shape: f32[32,32], index: 5, kind: input, shape index: {}]   ;;  %s2668_s6 = inlined_call_operand.vmem [shape: f32[1,32], index: 6, kind: input, shape index: {}]   ;;  %s2669_s7 = inlined_call_operand.vmem [shape: f32[1,32], index: 7, kind: input, shape index: {}]   ;;  %s2670_s8 = inlined_call_operand.vmem [shape: f32[1,32], index: 8, kind: input, shape index: {}]   ;;  %s2671_s9 = inlined_call_operand.vmem [shape: f32[32,64], index: 9, kind: input, shape index: {}]   ;;  %s2672_s10 = inlined_call_operand.vmem [shape: f32[1,64], index: 10, kind: input, shape index: {}]   ;;  %s2673_s11 = inlined_call_operand.vmem [shape: f32[64,32], index: 11, kind: input, shape index: {}]   ;;  %s2674_s12 = inlined_call_operand.vmem [shape: f32[1,32], index: 12, kind: input, shape index: {}]   ;;  %s2675_s13 = inlined_call_operand.hbm [shape: f32[16,32], index: 13, kind: output, shape index: {}]  }
   0x1   :  { %19 = vsyncpa [#allocation4], 0  ;;  %s2291_s25 = smov [#allocation2]   ;;  %s2243_s29 = scalar_lea.hbm %s2662_s0, 256 }
   0x2   :  { %s25_s26 = sshll.u32 %s2291_s25, 4  ;;  %p2244_p0 = scmp.ne.s32.totalorder %s2662_s0, %s2243_s29  ;;  %s26_s26 = int_to_ptr.vmem [resolvable:$true] %s25_s26 }
   0x3   :  { %p2247_p1 = scmp.lt.u32.totalorder %s2243_s29, %s2662_s0 }
   0x5   :  { %p2249_p2 = pnand %p2247_p1, %p2244_p0 }
   0x7   :  { %2252 = shalt.err (!%p2249_p2)
}
   0x8   :  { %s2253_s17 = scalar_lea.vmem %s26_s26, 256  ;;  %p2258_p4 = scmp.lt.s32.totalorder %s26_s26, %s26_s26 }
   0x9   :  { %p2254_p3 = scmp.ne.s32.totalorder %s26_s26, %s2253_s17  ;;  %p2259_p5 = scmp.lt.s32.totalorder %s2253_s17, %s2253_s17 }
   0xb   :  { %p2260_p6 = por %p2259_p5, %p2258_p4 }
   0xd   :  { %p2261_p7 = pnand %p2260_p6, %p2254_p3 }
   0xf   :  { %2264 = shalt.err (!%p2261_p7)
}
  0x10   :  { %s2292_s18 = smov 128   ;;  %s2293_s19 = smov 8  }
  0x11   :  { %31 = dma.hbm_to_vmem [thread:$0]  %s2662_s0, 256, %s26_s26, [#allocation3], %s2292_s18, %s2292_s18, %s2293_s19  }
  0x12   :  { %2287 = dma.done.wait [#allocation3], 256  }
  0x13   :  { %2288 = vsyncadd [#allocation3], 4294967040  ;;  %vm63_vm0 = vcmask 261120   ;;  %v2395_v0 = vld [vmem:[#allocation2] sm:$0xff]  ;;  %v2397_v1 = vld [vmem:[#allocation2 + $0x8] sm:$0xff]  ;;  %v2294_v36 = vmov 0.0  }
  0x14   :  { %v64_v2 = vsel %vm63_vm0, %v2395_v0, 0.0  ;;  %v67_v3 = vsel %vm63_vm0, %v2397_v1, 0.0  ;;  %v107_v14 = vld [vmem:[%s2665_s3] sm:$0xff]  ;;  %v108_v15 = vld [vmem:[%s2665_s3 + $0x8] sm:$0xff]  ;;  %v109_v16 = vld [vmem:[%s2665_s3 + $0x10] sm:$0xff]  ;;  %2029 = vmatprep.subr.mxu0 %v2294_v36  ;;  %vm2295_vm1 = vmmov 0  }
  0x15   :  { %65 = vadd.xlane.f32.xlu0 %v64_v2  ;;  %v2140_v17 = vpack.c.bf16 %v108_v15, %v107_v14  ;;  %v110_v18 = vld [vmem:[%s2665_s3 + $0x18] sm:$0xff]  ;;  %v1908_v27 = vld [vmem:[%s2663_s1] ss:$0 sm:$0xff]  ;;  %2031 = vmatprep.mubr.msk.f32.mxu0 %vm2295_vm1, %v2294_v36  ;;  %s2296_s15 = smov 96   ;;  %vm202_vm2 = vcmask 64512   ;;  %s2298_s16 = smov 88  }
  0x16   :  { %v2144_v19 = vpack.c.bf16 %v110_v18, %v109_v16  ;;  %v1909_v29 = vld [vmem:[%s2664_s2] ss:$0 sm:$0xff]  ;;  %s2299_s17 = smov 120   ;;  %s2300_s20 = smov 56   ;;  %vm1547_vm3 = vcmask 195584   ;;  %vm1544_vm4 = vcmask 130048  }
  0x17   :  { %2141 = vmatprep.subr.bf16.mxu1 %v2140_v17  ;;  %v1910_v37 = vld [vmem:[%s2666_s4] ss:$0 sm:$0xff]  ;;  %s2297_s4 = smov 64   ;;  %s2301_s21 = smov 80   ;;  %vm1805_vm5 = vcmask 523264  }
  0x18   :  { %2143 = vmatpush3.bf16.msra.mxu1 %v2140_v17  ;;  %s2302_s0 = smov 112   ;;  %s2303_s22 = smov 48  }
  0x19   :  { %68 = vadd.xlane.f32.xlu0 %v67_v3  ;;  %2145 = vmatprep.subr.bf16.mxu1 %v2144_v19  ;;  %s2304_s23 = smov 72   ;;  %s2305_s24 = smov 104  }
  0x1a   :  { %s2306_s25 = smov 40   ;;  %s2307_s26 = smov 16  }
  0x1c   :  { %2147 = vmatpush3.bf16.msra.mxu1 %v2144_v19 }
  0x1d   :  { %2019 = vmatprep.subr.mxu1 %v2294_v36 }
  0xa2   :  { %v66_v4 = vpop.xlane.xlu0 %65 }
  0xa3   :  { %v71_v5 = vmul.f32 0.03125, %v66_v4 }
  0xa5   :  { %v73_v6 = vsub.f32 %v2395_v0, %v71_v5 }
  0xa6   :  { %v69_v7 = vpop.xlane.xlu0 %68 }
  0xa7   :  { %v72_v8 = vmul.f32 0.03125, %v69_v7  ;;  %v75_v9 = vmul.f32 %v73_v6, %v73_v6 }
  0xa9   :  { %v74_v10 = vsub.f32 %v2397_v1, %v72_v8  ;;  %v77_v11 = vsel %vm63_vm0, %v75_v9, 0.0 }
  0xaa   :  { %78 = vadd.xlane.f32.xlu1 %v77_v11 }
  0xab   :  { %v76_v12 = vmul.f32 %v74_v10, %v74_v10 }
  0xad   :  { %v80_v13 = vsel %vm63_vm0, %v76_v12, 0.0 }
  0xae   :  { %81 = vadd.xlane.f32.xlu1 %v80_v13 }
 0x137   :  { %v79_v20 = vpop.xlane.xlu1 %78 }
 0x138   :  { %v83_v21 = vmul.f32 0.03125, %v79_v20 }
 0x13a   :  { %v85_v22 = vadd.f32 1e-05, %v83_v21 }
 0x13b   :  { %v82_v23 = vpop.xlane.xlu1 %81 }
 0x13c   :  { %2199 = vrsqrt.f32 %v85_v22  ;;  %v84_v24 = vmul.f32 0.03125, %v82_v23 }
 0x13e   :  { %v86_v25 = vadd.f32 1e-05, %v84_v24 }
 0x140   :  { %2201 = vrsqrt.f32 %v86_v25 }
 0x146   :  { %v2200_v26 = vpop.eup %2199 }
 0x147   :  { %v89_v28 = vmul.f32 %v2200_v26, %v73_v6 }
 0x149   :  { %v97_v30 = vmul.f32 %v1908_v27, %v89_v28 }
 0x14a   :  { %v2202_v31 = vpop.eup %2201 }
 0x14b   :  { %v90_v32 = vmul.f32 %v2202_v31, %v74_v10  ;;  %v105_v33 = vadd.f32 %v1909_v29, %v97_v30 }
 0x14d   :  { %v98_v34 = vmul.f32 %v1908_v27, %v90_v32  ;;  %2016 = vmatprep.mubr.msk.f32.mxu1 %vm63_vm0, %v105_v33 }
 0x14f   :  { %v106_v35 = vadd.f32 %v1909_v29, %v98_v34 }
 0x151   :  { %2017 = vmatmul.mubr.msk.f32.vlgmr.msra.gmra.mrb[0].mxu1 %vm63_vm0, %v106_v35 }
 0x152   :  { %2021 = vmatprep.mubr.msk.f32.mxu1 %vm2295_vm1, %v2294_v36 }
 0x224   :  { %v2018_v38 = vpop.f32.mrb[0].mxu1 }
 0x225   :  { %v2436_v39 = vadd.f32 %v2018_v38, %v1910_v37  ;;  %v190_v40 = vpop.f32.mrb[1].mxu1 }
 0x226   :  { %v2438_v41 = vadd.f32 %v1910_v37, %v190_v40 }
 0x227   :  { %278 = vrot.lane.b32.xlu1 %v2436_v39, %s2296_s15 }
 0x228   :  { %200 = vrot.lane.b32.xlu0 %v2438_v41, %s2296_s15  ;;  %s2308_s15 = smov 24  }
 0x299   :  { %v279_v43 = vpop.permute.xlu1 %278 }
 0x29a   :  { %v201_v42 = vpop.permute.xlu0 %200 }
 0x29b   :  { %2020 = vmatpush3.xpose.msk.msra.mxu1 %vm202_vm2, %v201_v42 }
 0x29c   :  { %2024 = vmatprep.subr.mxu1 %v2294_v36 }
 0x29e   :  { %2022 = vmatmul.mubr.msk.f32.vlgmr.msra.gmra.mrb[2].mxu1 %vm202_vm2, %v2438_v41 }
 0x29f   :  { %2025 = vmatpush3.xpose.msk.msra.mxu1 %vm202_vm2, %v279_v43  ;;  %2026 = vmatprep.mubr.msk.f32.mxu1 %vm2295_vm1, %v2294_v36 }
 0x2a0   :  { %2034 = vmatprep.subr.mxu1 %v2294_v36 }
 0x2a2   :  { %2027 = vmatmul.mubr.msk.f32.vlgmr.msra.gmra.mrb[4].mxu1 %vm202_vm2, %v2436_v39 }
 0x2a3   :  { %2036 = vmatprep.mubr.msk.f32.mxu1 %vm2295_vm1, %v2294_v36 }
 0x371   :  { %v273_v44 = vpop.f32.mrb[2].mxu1 }
 0x372   :  { %v2023_v45 = vpop.f32.mrb[3].mxu1  ;;  %v354_v46 = vsel %vm202_vm2, %v273_v44, -inf }
 0x373   :  { %355 = vmax.xlane.f32.xlu1 %v354_v46 }
 0x375   :  { %v350_v47 = vpop.f32.mrb[4].mxu1 }
 0x376   :  { %v2028_v48 = vpop.f32.mrb[5].mxu1  ;;  %v357_v49 = vsel %vm202_vm2, %v350_v47, -inf }
 0x377   :  { %358 = vmax.xlane.f32.xlu0 %v357_v49 }
 0x384   :  { %452 = vrot.lane.b32.xlu1 %v2436_v39, %s2297_s4 }
 0x388   :  { %530 = vrot.lane.b32.xlu1 %v2438_v41, %s2298_s16 }
 0x38c   :  { %608 = vrot.lane.b32.xlu1 %v2436_v39, %s2298_s16 }
 0x38d   :  { %376 = vrot.lane.b32.xlu0 %v2438_v41, %s2297_s4 }
 0x400   :  { %v356_v50 = vpop.xlane.xlu1 %355 }
 0x401   :  { %v360_v51 = vsub.f32 %v273_v44, %v356_v50 }
 0x403   :  { %v362_v52 = vmul.f32 1.442695, %v360_v51 }
 0x404   :  { %v453_v53 = vpop.permute.xlu1 %452  ;;  %v359_v54 = vpop.xlane.xlu0 %358 }
 0x405   :  { %2203 = vpow2.f32 %v362_v52  ;;  %v361_v55 = vsub.f32 %v350_v47, %v359_v54  ;;  %2035 = vmatpush3.msra.mxu1 %v453_v53 }
 0x406   :  { %2044 = vmatprep.subr.mxu1 %v2294_v36 }
 0x407   :  { %v364_v56 = vmul.f32 1.442695, %v361_v55 }
 0x408   :  { %v377_v57 = vpop.permute.xlu0 %376  ;;  %v531_v62 = vpop.permute.xlu1 %530 }
 0x409   :  { %2205 = vpow2.f32 %v364_v56  ;;  %2030 = vmatpush3.msra.mxu0 %v377_v57 }
 0x40a   :  { %2039 = vmatprep.subr.mxu0 %v2294_v36 }
 0x40c   :  { %v609_v63 = vpop.permute.xlu1 %608 }
 0x40f   :  { %v2204_v58 = vpop.eup %2203 }
 0x410   :  { %v366_v59 = vsel %vm202_vm2, %v2204_v58, 0.0 }
 0x411   :  { %367 = vadd.xlane.f32.xlu0 %v366_v59 }
 0x413   :  { %v2206_v60 = vpop.eup %2205 }
 0x414   :  { %v369_v61 = vsel %vm202_vm2, %v2206_v60, 0.0 }
 0x415   :  { %370 = vadd.xlane.f32.xlu1 %v369_v61 }
 0x426   :  { %606 = vrot.lane.b32.xlu1 %v2436_v39, %s2299_s17 }
 0x427   :  { %528 = vrot.lane.b32.xlu0 %v2438_v41, %s2299_s17 }
 0x49e   :  { %v368_v2 = vpop.xlane.xlu0 %367 }
 0x49f   :  { %2207 = vrcp.f32 %v368_v2 }
 0x4a2   :  { %v371_v3 = vpop.xlane.xlu1 %370  ;;  %v529_v8 = vpop.permute.xlu0 %528 }
 0x4a3   :  { %2209 = vrcp.f32 %v371_v3 }
 0x4a6   :  { %v607_v9 = vpop.permute.xlu1 %606 }
 0x4a9   :  { %v2208_v4 = vpop.eup %2207 }
 0x4aa   :  { %v374_v5 = vmul.f32 %v2208_v4, %v2204_v58 }
 0x4ac   :  { %2032 = vmatmul.mubr.msk.f32.vlgmr.msra.gmra.mrb[0].mxu0 %vm202_vm2, %v374_v5 }
 0x4ad   :  { %v2210_v6 = vpop.eup %2209  ;;  %2040 = vmatpush3.xpose.msk.msra.mxu0 %vm202_vm2, %v531_v62  ;;  %2041 = vmatprep.mubr.msk.f32.mxu0 %vm2295_vm1, %v2294_v36 }
 0x4ae   :  { %v375_v7 = vmul.f32 %v2210_v6, %v2206_v60  ;;  %2049 = vmatprep.subr.mxu0 %v2294_v36 }
 0x4b0   :  { %2037 = vmatmul.mubr.msk.f32.vlgmr.msra.gmra.mrb[6].mxu1 %vm202_vm2, %v375_v7  ;;  %2042 = vmatmul.mubr.msk.f32.vlgmr.msra.gmra.mrb[2].mxu0 %vm202_vm2, %v529_v8 }
 0x4b1   :  { %2045 = vmatpush3.xpose.msk.msra.mxu1 %vm202_vm2, %v609_v63  ;;  %2046 = vmatprep.mubr.msk.f32.mxu1 %vm2295_vm1, %v2294_v36 }
 0x4b2   :  { %2054 = vmatprep.subr.mxu1 %v2294_v36  ;;  %2051 = vmatprep.mubr.msk.f32.mxu0 %vm2295_vm1, %v2294_v36 }
 0x4b4   :  { %2047 = vmatmul.mubr.msk.f32.vlgmr.msra.gmra.mrb[8].mxu1 %vm202_vm2, %v607_v9 }
 0x4b5   :  { %2056 = vmatprep.mubr.msk.f32.mxu1 %vm2295_vm1, %v2294_v36 }
 0x57f   :  { %v2482_v10 = vpop.f32.mrb[0].mxu0 }
 0x580   :  { %v2033_v11 = vpop.f32.mrb[1].mxu0 }
 0x583   :  { %v2484_v12 = vpop.f32.mrb[6].mxu1  ;;  %v602_v13 = vpop.f32.mrb[2].mxu0 }
 0x584   :  { %v2038_v14 = vpop.f32.mrb[7].mxu1  ;;  %v2043_v15 = vpop.f32.mrb[3].mxu0  ;;  %v684_v16 = vsel %vm202_vm2, %v602_v13, -inf }
 0x585   :  { %685 = vmax.xlane.f32.xlu0 %v684_v16 }
 0x587   :  { %v680_v17 = vpop.f32.mrb[8].mxu1 }
 0x588   :  { %v2048_v18 = vpop.f32.mrb[9].mxu1  ;;  %v687_v19 = vsel %vm202_vm2, %v680_v17, -inf }
 0x589   :  { %688 = vmax.xlane.f32.xlu1 %v687_v19 }
 0x59a   :  { %782 = vrot.lane.b32.xlu1 %v2436_v39, %s2300_s20 }
 0x59b   :  { %706 = vrot.lane.b32.xlu0 %v2438_v41, %s2300_s20 }
 0x59e   :  { %860 = vrot.lane.b32.xlu1 %v2438_v41, %s2301_s21 }
 0x5a2   :  { %938 = vrot.lane.b32.xlu1 %v2436_v39, %s2301_s21 }
 0x5a6   :  { %936 = vrot.lane.b32.xlu1 %v2436_v39, %s2302_s0 }
 0x612   :  { %v686_v20 = vpop.xlane.xlu0 %685 }
 0x613   :  { %v690_v21 = vsub.f32 %v602_v13, %v686_v20 }
 0x615   :  { %v692_v22 = vmul.f32 1.442695, %v690_v21 }
 0x616   :  { %v707_v23 = vpop.permute.xlu0 %706  ;;  %v689_v24 = vpop.xlane.xlu1 %688 }
 0x617   :  { %2211 = vpow2.f32 %v692_v22  ;;  %v691_v25 = vsub.f32 %v680_v17, %v689_v24  ;;  %2050 = vmatpush3.msra.mxu0 %v707_v23 }
 0x618   :  { %2059 = vmatprep.subr.mxu0 %v2294_v36 }
 0x619   :  { %v694_v26 = vmul.f32 1.442695, %v691_v25 }
 0x61a   :  { %v783_v27 = vpop.permute.xlu1 %782 }
 0x61b   :  { %2213 = vpow2.f32 %v694_v26  ;;  %2055 = vmatpush3.msra.mxu1 %v783_v27 }
 0x61c   :  { %2064 = vmatprep.subr.mxu1 %v2294_v36 }
 0x61e   :  { %v861_v34 = vpop.permute.xlu1 %860 }
 0x621   :  { %v2212_v28 = vpop.eup %2211 }
 0x622   :  { %v696_v29 = vsel %vm202_vm2, %v2212_v28, 0.0  ;;  %v939_v40 = vpop.permute.xlu1 %938 }
 0x623   :  { %697 = vadd.xlane.f32.xlu0 %v696_v29 }
 0x625   :  { %v2214_v30 = vpop.eup %2213 }
 0x626   :  { %v699_v31 = vsel %vm202_vm2, %v2214_v30, 0.0  ;;  %v937_v44 = vpop.permute.xlu1 %936 }
 0x627   :  { %700 = vadd.xlane.f32.xlu0 %v699_v31 }
 0x63d   :  { %858 = vrot.lane.b32.xlu0 %v2438_v41, %s2302_s0  ;;  %s2309_s0 = smov [#allocation5]  }
 0x6b0   :  { %v698_v32 = vpop.xlane.xlu0 %697 }
 0x6b1   :  { %2215 = vrcp.f32 %v698_v32 }
 0x6b4   :  { %v701_v33 = vpop.xlane.xlu0 %700 }
 0x6b5   :  { %2217 = vrcp.f32 %v701_v33 }
 0x6b8   :  { %v859_v43 = vpop.permute.xlu0 %858 }
 0x6bb   :  { %v2216_v35 = vpop.eup %2215 }
 0x6bc   :  { %v704_v37 = vmul.f32 %v2216_v35, %v2212_v28 }
 0x6be   :  { %2052 = vmatmul.mubr.msk.f32.vlgmr.msra.gmra.mrb[4].mxu0 %vm202_vm2, %v704_v37 }
 0x6bf   :  { %v2218_v38 = vpop.eup %2217  ;;  %2060 = vmatpush3.xpose.msk.msra.mxu0 %vm202_vm2, %v861_v34  ;;  %2061 = vmatprep.mubr.msk.f32.mxu0 %vm2295_vm1, %v2294_v36 }
 0x6c0   :  { %v705_v42 = vmul.f32 %v2218_v38, %v2214_v30  ;;  %2069 = vmatprep.subr.mxu0 %v2294_v36 }
 0x6c2   :  { %2057 = vmatmul.mubr.msk.f32.vlgmr.msra.gmra.mrb[10].mxu1 %vm202_vm2, %v705_v42  ;;  %2062 = vmatmul.mubr.msk.f32.vlgmr.msra.gmra.mrb[6].mxu0 %vm202_vm2, %v859_v43 }
 0x6c3   :  { %2065 = vmatpush3.xpose.msk.msra.mxu1 %vm202_vm2, %v939_v40  ;;  %2066 = vmatprep.mubr.msk.f32.mxu1 %vm2295_vm1, %v2294_v36 }
 0x6c4   :  { %2074 = vmatprep.subr.mxu1 %v2294_v36  ;;  %2071 = vmatprep.mubr.msk.f32.mxu0 %vm2295_vm1, %v2294_v36 }
 0x6c6   :  { %2067 = vmatmul.mubr.msk.f32.vlgmr.msra.gmra.mrb[12].mxu1 %vm202_vm2, %v937_v44 }
 0x6c7   :  { %2076 = vmatprep.mubr.msk.f32.mxu1 %vm2295_vm1, %v2294_v36 }
 0x791   :  { %v2514_v45 = vpop.f32.mrb[4].mxu0 }
 0x792   :  { %v2053_v46 = vpop.f32.mrb[5].mxu0 }
 0x793   :  { %v1550_v46 = vld [vmem:[%s2667_s5] sm:$0xff] }
 0x795   :  { %v2516_v47 = vpop.f32.mrb[10].mxu1  ;;  %v932_v48 = vpop.f32.mrb[6].mxu0 }
 0x796   :  { %v2058_v49 = vpop.f32.mrb[11].mxu1  ;;  %v2063_v50 = vpop.f32.mrb[7].mxu0  ;;  %v1014_v51 = vsel %vm202_vm2, %v932_v48, -inf }
 0x797   :  { %1015 = vmax.xlane.f32.xlu0 %v1014_v51  ;;  %v1553_v49 = vld [vmem:[%s2667_s5 + $0x18] sm:$0xff] }
 0x799   :  { %v1010_v52 = vpop.f32.mrb[12].mxu1 }
 0x79a   :  { %v2068_v53 = vpop.f32.mrb[13].mxu1  ;;  %v1017_v54 = vsel %vm202_vm2, %v1010_v52, -inf }
 0x79b   :  { %1018 = vmax.xlane.f32.xlu1 %v1017_v54 }
 0x7ac   :  { %1112 = vrot.lane.b32.xlu1 %v2436_v39, %s2303_s22 }
 0x7ad   :  { %1036 = vrot.lane.b32.xlu0 %v2438_v41, %s2303_s22  ;;  %s1896_s22 = sshll.u32 %s2309_s0, 4  ;;  %s1897_s22 = int_to_ptr.vmem [resolvable:$true] %s1896_s22 }
 0x7ae   :  { %p2270_p9 = scmp.lt.s32.totalorder %s1897_s22, %s1897_s22 }
 0x7b0   :  { %1190 = vrot.lane.b32.xlu1 %v2438_v41, %s2304_s23 }
 0x7b4   :  { %1268 = vrot.lane.b32.xlu1 %v2436_v39, %s2304_s23  ;;  %s2265_s23 = scalar_lea.vmem %s1897_s22, 256 }
 0x7b5   :  { %p2266_p8 = scmp.ne.s32.totalorder %s1897_s22, %s2265_s23  ;;  %p2271_p10 = scmp.lt.s32.totalorder %s2265_s23, %s2265_s23 }
 0x7b7   :  { %p2272_p11 = por %p2271_p10, %p2270_p9 }
 0x7b8   :  { %1266 = vrot.lane.b32.xlu1 %v2436_v39, %s2305_s24 }
 0x7b9   :  { %p2273_p12 = pnand %p2272_p11, %p2266_p8 }
 0x824   :  { %v1016_v55 = vpop.xlane.xlu0 %1015 }
 0x825   :  { %v1020_v56 = vsub.f32 %v932_v48, %v1016_v55  ;;  %v1552_v48 = vld [vmem:[%s2667_s5 + $0x10] sm:$0xff] }
 0x826   :  { %v2152_v50 = vpack.c.bf16 %v1553_v49, %v1552_v48  ;;  %v1793_v48 = vld [vmem:[%s2673_s11 + $0x18] sm:$0xff] }
 0x827   :  { %v1022_v57 = vmul.f32 1.442695, %v1020_v56 }
 0x828   :  { %v1037_v58 = vpop.permute.xlu0 %1036  ;;  %v1019_v59 = vpop.xlane.xlu1 %1018 }
 0x829   :  { %2219 = vpow2.f32 %v1022_v57  ;;  %v1021_v60 = vsub.f32 %v1010_v52, %v1019_v59  ;;  %2070 = vmatpush3.msra.mxu0 %v1037_v58 }
 0x82a   :  { %2079 = vmatprep.subr.mxu0 %v2294_v36 }
 0x82b   :  { %v1024_v61 = vmul.f32 1.442695, %v1021_v60 }
 0x82c   :  { %v1113_v62 = vpop.permute.xlu1 %1112 }
 0x82d   :  { %2221 = vpow2.f32 %v1024_v61  ;;  %2075 = vmatpush3.msra.mxu1 %v1113_v62 }
 0x82e   :  { %2084 = vmatprep.subr.mxu1 %v2294_v36 }
 0x830   :  { %v1191_v7 = vpop.permute.xlu1 %1190 }
 0x833   :  { %v2220_v63 = vpop.eup %2219 }
 0x834   :  { %v1026_v2 = vsel %vm202_vm2, %v2220_v63, 0.0  ;;  %v1269_v13 = vpop.permute.xlu1 %1268 }
 0x835   :  { %1027 = vadd.xlane.f32.xlu0 %v1026_v2 }
 0x837   :  { %v2222_v3 = vpop.eup %2221 }
 0x838   :  { %v1029_v4 = vsel %vm202_vm2, %v2222_v3, 0.0  ;;  %v1267_v16 = vpop.permute.xlu1 %1266 }
 0x839   :  { %1030 = vadd.xlane.f32.xlu0 %v1029_v4 }
 0x84f   :  { %1188 = vrot.lane.b32.xlu0 %v2438_v41, %s2305_s24 }
 0x8c2   :  { %v1028_v5 = vpop.xlane.xlu0 %1027 }
 0x8c3   :  { %2223 = vrcp.f32 %v1028_v5  ;;  %v1937_v5 = vld [vmem:[%s2668_s6] ss:$0 sm:$0xff] }
 0x8c6   :  { %v1031_v6 = vpop.xlane.xlu0 %1030 }
 0x8c7   :  { %2225 = vrcp.f32 %v1031_v6 }
 0x8ca   :  { %v1189_v15 = vpop.permute.xlu0 %1188 }
 0x8cd   :  { %v2224_v8 = vpop.eup %2223 }
 0x8ce   :  { %v1034_v9 = vmul.f32 %v2224_v8, %v2220_v63 }
 0x8d0   :  { %2072 = vmatmul.mubr.msk.f32.vlgmr.msra.gmra.mrb[8].mxu0 %vm202_vm2, %v1034_v9 }
 0x8d1   :  { %v2226_v11 = vpop.eup %2225  ;;  %2080 = vmatpush3.xpose.msk.msra.mxu0 %vm202_vm2, %v1191_v7  ;;  %2081 = vmatprep.mubr.msk.f32.mxu0 %vm2295_vm1, %v2294_v36 }
 0x8d2   :  { %v1035_v14 = vmul.f32 %v2226_v11, %v2222_v3  ;;  %2089 = vmatprep.subr.mxu0 %v2294_v36 }
 0x8d4   :  { %2077 = vmatmul.mubr.msk.f32.vlgmr.msra.gmra.mrb[14].mxu1 %vm202_vm2, %v1035_v14  ;;  %2082 = vmatmul.mubr.msk.f32.vlgmr.msra.gmra.mrb[10].mxu0 %vm202_vm2, %v1189_v15 }
 0x8d5   :  { %2085 = vmatpush3.xpose.msk.msra.mxu1 %vm202_vm2, %v1269_v13  ;;  %2086 = vmatprep.mubr.msk.f32.mxu1 %vm2295_vm1, %v2294_v36 }
 0x8d6   :  { %2094 = vmatprep.subr.mxu1 %v2294_v36  ;;  %2091 = vmatprep.mubr.msk.f32.mxu0 %vm2295_vm1, %v2294_v36 }
 0x8d8   :  { %2087 = vmatmul.mubr.msk.f32.vlgmr.msra.gmra.mrb[16].mxu1 %vm202_vm2, %v1267_v16 }
 0x8d9   :  { %2096 = vmatprep.mubr.msk.f32.mxu1 %vm2295_vm1, %v2294_v36 }
 0x9a3   :  { %v1108_v17 = vpop.f32.mrb[8].mxu0 }
 0x9a4   :  { %v2073_v18 = vpop.f32.mrb[9].mxu0 }
 0x9a7   :  { %v1184_v19 = vpop.f32.mrb[14].mxu1  ;;  %v1262_v20 = vpop.f32.mrb[10].mxu0 }
 0x9a8   :  { %v2078_v21 = vpop.f32.mrb[15].mxu1  ;;  %v2083_v22 = vpop.f32.mrb[11].mxu0  ;;  %v1344_v23 = vsel %vm202_vm2, %v1262_v20, -inf }
 0x9a9   :  { %1345 = vmax.xlane.f32.xlu0 %v1344_v23  ;;  %v1688_v22 = vld [vmem:[%s2671_s9] sm:$0xff]  ;;  %v1689_v23 = vld [vmem:[%s2671_s9 + $0x8] sm:$0xff] }
 0x9ab   :  { %v1340_v24 = vpop.f32.mrb[16].mxu1 }
 0x9ac   :  { %v2088_v25 = vpop.f32.mrb[17].mxu1  ;;  %v1347_v26 = vsel %vm202_vm2, %v1340_v24, -inf }
 0x9ad   :  { %1348 = vmax.xlane.f32.xlu1 %v1347_v26  ;;  %v1690_v25 = vld [vmem:[%s2671_s9 + $0x10] sm:$0xff]  ;;  %v1691_v26 = vld [vmem:[%s2671_s9 + $0x18] sm:$0xff] }
 0x9be   :  { %1442 = vrot.lane.b32.xlu1 %v2436_v39, %s2306_s25 }
 0x9c2   :  { %1520 = vrot.lane.b32.xlu1 %v2514_v45, %s2293_s19 }
 0x9c6   :  { %1522 = vrot.lane.b32.xlu1 %v2516_v47, %s2293_s19 }
 0x9ca   :  { %1530 = vrot.lane.b32.xlu1 %v1184_v19, %s2307_s26 }
 0xa36   :  { %v1346_v36 = vpop.xlane.xlu0 %1345 }
 0xa37   :  { %v1350_v27 = vsub.f32 %v1262_v20, %v1346_v36  ;;  %v2160_v36 = vpack.c.bf16 %v1691_v26, %v1690_v25 }
 0xa39   :  { %v1352_v28 = vmul.f32 1.442695, %v1350_v27 }
 0xa3a   :  { %v1349_v29 = vpop.xlane.xlu1 %1348 }
 0xa3b   :  { %2227 = vpow2.f32 %v1352_v28  ;;  %v1351_v30 = vsub.f32 %v1340_v24, %v1349_v29  ;;  %v2156_v24 = vpack.c.bf16 %v1689_v23, %v1688_v22 }
 0xa3d   :  { %v1354_v31 = vmul.f32 1.442695, %v1351_v30 }
 0xa3e   :  { %v1443_v32 = vpop.permute.xlu1 %1442 }
 0xa3f   :  { %2229 = vpow2.f32 %v1354_v31  ;;  %2095 = vmatpush3.msra.mxu1 %v1443_v32 }
 0xa40   :  { %2157 = vmatprep.subr.bf16.mxu1 %v2156_v24 }
 0xa42   :  { %v1521_v55 = vpop.permute.xlu1 %1520 }
 0xa43   :  { %v1542_v58 = vsel %vm202_vm2, %v2482_v10, %v1521_v55 }
 0xa45   :  { %v2228_v33 = vpop.eup %2227 }
 0xa46   :  { %v1356_v39 = vsel %vm202_vm2, %v2228_v33, 0.0  ;;  %v1523_v56 = vpop.permute.xlu1 %1522 }
 0xa47   :  { %1357 = vadd.xlane.f32.xlu0 %v1356_v39  ;;  %v1543_v63 = vsel %vm202_vm2, %v2484_v12, %v1523_v56  ;;  %v1940_v39 = vld [vmem:[%s2669_s7] ss:$0 sm:$0xff] }
 0xa48   :  { %v1942_v56 = vld [vmem:[%s2672_s10] ss:$0 sm:$0xff] }
 0xa49   :  { %v2230_v34 = vpop.eup %2229 }
 0xa4a   :  { %v1359_v35 = vsel %vm202_vm2, %v2230_v34, 0.0  ;;  %v1531_v59 = vpop.permute.xlu1 %1530 }
 0xa4b   :  { %1360 = vadd.xlane.f32.xlu0 %v1359_v35  ;;  %v1546_v2 = vsel %vm1544_vm4, %v1543_v63, %v1531_v59  ;;  %v1941_v35 = vld [vmem:[%s2670_s8] ss:$0 sm:$0xff] }
 0xa61   :  { %1366 = vrot.lane.b32.xlu0 %v2438_v41, %s2306_s25  ;;  %v1551_v41 = vld [vmem:[%s2667_s5 + $0x8] sm:$0xff] }
 0xa62   :  { %v2148_v47 = vpack.c.bf16 %v1551_v41, %v1550_v46  ;;  %v1791_v46 = vld [vmem:[%s2673_s11 + $0x8] sm:$0xff] }
 0xa65   :  { %1528 = vrot.lane.b32.xlu0 %v1108_v17, %s2307_s26 }
 0xad4   :  { %v1358_v37 = vpop.xlane.xlu0 %1357 }
 0xad5   :  { %2231 = vrcp.f32 %v1358_v37 }
 0xad8   :  { %v1361_v38 = vpop.xlane.xlu0 %1360 }
 0xad9   :  { %2233 = vrcp.f32 %v1361_v38 }
 0xadc   :  { %v1367_v40 = vpop.permute.xlu0 %1366 }
 0xadd   :  { %2090 = vmatpush3.msra.mxu0 %v1367_v40 }
 0xade   :  { %2149 = vmatprep.subr.bf16.mxu0 %v2148_v47 }
 0xadf   :  { %v2232_v42 = vpop.eup %2231 }
 0xae0   :  { %v1364_v43 = vmul.f32 %v2232_v42, %v2228_v33  ;;  %v1529_v57 = vpop.permute.xlu0 %1528 }
 0xae1   :  { %v1545_v60 = vsel %vm1544_vm4, %v1542_v58, %v1529_v57 }
 0xae2   :  { %2092 = vmatmul.mubr.msk.f32.vlgmr.msra.gmra.mrb[12].mxu0 %vm202_vm2, %v1364_v43 }
 0xae3   :  { %v2234_v44 = vpop.eup %2233  ;;  %2151 = vmatpush3.bf16.msra.mxu0 %v2148_v47  ;;  %v1792_v47 = vld [vmem:[%s2673_s11 + $0x10] sm:$0xff] }
 0xae4   :  { %v1365_v45 = vmul.f32 %v2234_v44, %v2230_v34  ;;  %2153 = vmatprep.subr.bf16.mxu0 %v2152_v50  ;;  %v2168_v49 = vpack.c.bf16 %v1793_v48, %v1792_v47 }
 0xae6   :  { %2097 = vmatmul.mubr.msk.f32.vlgmr.msra.gmra.mrb[18].mxu1 %vm202_vm2, %v1365_v45  ;;  %v1790_v45 = vld [vmem:[%s2673_s11] sm:$0xff] }
 0xae7   :  { %2155 = vmatpush3.bf16.msra.mxu0 %v2152_v50  ;;  %2159 = vmatpush3.bf16.msra.mxu1 %v2156_v24  ;;  %v2164_v41 = vpack.c.bf16 %v1791_v46, %v1790_v45  ;;  %v1794_v50 = vld [vmem:[%s2673_s11 + $0x20] sm:$0xff] }
 0xae8   :  { %2161 = vmatprep.subr.bf16.mxu1 %v2160_v36 }
 0xae9   :  { %2165 = vmatprep.subr.bf16.mxu0 %v2164_v41 }
 0xaeb   :  { %2163 = vmatpush3.bf16.msra.mxu1 %v2160_v36 }
 0xbb5   :  { %v1438_v51 = vpop.f32.mrb[12].mxu0 }
 0xbb6   :  { %1536 = vrot.lane.b32.xlu0 %v1438_v51, %s2308_s15  ;;  %v2093_v52 = vpop.f32.mrb[13].mxu0  ;;  %v1795_v51 = vld [vmem:[%s2673_s11 + $0x28] sm:$0xff] }
 0xbb7   :  { %v2172_v52 = vpack.c.bf16 %v1795_v51, %v1794_v50 }
 0xbb9   :  { %v1514_v53 = vpop.f32.mrb[18].mxu1 }
 0xbba   :  { %1538 = vrot.lane.b32.xlu1 %v1514_v53, %s2308_s15  ;;  %v2098_v54 = vpop.f32.mrb[19].mxu1  ;;  %v1796_v53 = vld [vmem:[%s2673_s11 + $0x30] sm:$0xff] }
 0xbbb   :  { %v1797_v54 = vld [vmem:[%s2673_s11 + $0x38] sm:$0xff] }
 0xbbc   :  { %v2176_v55 = vpack.c.bf16 %v1797_v54, %v1796_v53 }
 0xc28   :  { %v1537_v61 = vpop.permute.xlu0 %1536 }
 0xc29   :  { %v1548_v62 = vsel %vm1547_vm3, %v1545_v60, %v1537_v61 }
 0xc2a   :  { %2107 = vmatprep.mubr.msk.f32.mxu0 %vm63_vm0, %v1548_v62 }
 0xc2c   :  { %v1539_v3 = vpop.permute.xlu1 %1538 }
 0xc2d   :  { %v1549_v4 = vsel %vm1547_vm3, %v1546_v2, %v1539_v3 }
 0xc2e   :  { %2108 = vmatmul.mubr.msk.f32.vlgmr.msra.gmra.mrb[14].mxu0 %vm63_vm0, %v1549_v4 }
 0xc2f   :  { %2167 = vmatpush3.bf16.msra.mxu0 %v2164_v41 }
 0xc30   :  { %2169 = vmatprep.subr.bf16.mxu0 %v2168_v49 }
 0xc33   :  { %2171 = vmatpush3.bf16.msra.mxu0 %v2168_v49 }
 0xc34   :  { %2173 = vmatprep.subr.bf16.mxu0 %v2172_v52 }
 0xc37   :  { %2175 = vmatpush3.bf16.msra.mxu0 %v2172_v52 }
 0xc38   :  { %2177 = vmatprep.subr.bf16.mxu0 %v2176_v55 }
 0xc3b   :  { %2179 = vmatpush3.bf16.msra.mxu0 %v2176_v55 }
 0xd01   :  { %v2109_v10 = vpop.f32.mrb[14].mxu0 }
 0xd02   :  { %v1639_v6 = vadd.f32 %v2109_v10, %v1937_v5  ;;  %v1633_v7 = vpop.f32.mrb[15].mxu0 }
 0xd03   :  { %v1634_v8 = vadd.f32 %v1937_v5, %v1633_v7 }
 0xd04   :  { %v2580_v9 = vadd.f32 %v1639_v6, %v2397_v1 }
 0xd05   :  { %v2583_v11 = vadd.f32 %v1634_v8, %v2395_v0  ;;  %v1945_v8 = vld [vmem:[%s2674_s12] ss:$0 sm:$0xff] }
 0xd06   :  { %v1649_v12 = vsel %vm63_vm0, %v2580_v9, 0.0 }
 0xd07   :  { %1650 = vadd.xlane.f32.xlu1 %v1649_v12  ;;  %v1646_v13 = vsel %vm63_vm0, %v2583_v11, 0.0 }
 0xd08   :  { %1647 = vadd.xlane.f32.xlu0 %v1646_v13 }
 0xd94   :  { %v1651_v14 = vpop.xlane.xlu1 %1650 }
 0xd95   :  { %v1653_v15 = vmul.f32 0.03125, %v1651_v14  ;;  %v1648_v16 = vpop.xlane.xlu0 %1647 }
 0xd96   :  { %v1652_v17 = vmul.f32 0.03125, %v1648_v16 }
 0xd97   :  { %v1655_v18 = vsub.f32 %v2580_v9, %v1653_v15 }
 0xd98   :  { %v1654_v1 = vsub.f32 %v2583_v11, %v1652_v17 }
 0xd99   :  { %v1657_v20 = vmul.f32 %v1655_v18, %v1655_v18 }
 0xd9a   :  { %v1656_v19 = vmul.f32 %v1654_v1, %v1654_v1 }
 0xd9b   :  { %v1661_v21 = vsel %vm63_vm0, %v1657_v20, 0.0 }
 0xd9c   :  { %v1658_v0 = vsel %vm63_vm0, %v1656_v19, 0.0 }
 0xd9d   :  { %1659 = vadd.xlane.f32.xlu0 %v1658_v0 }
 0xda1   :  { %1662 = vadd.xlane.f32.xlu0 %v1661_v21 }
 0xe2a   :  { %v1660_v27 = vpop.xlane.xlu0 %1659 }
 0xe2b   :  { %v1664_v28 = vmul.f32 0.03125, %v1660_v27 }
 0xe2d   :  { %v1666_v29 = vadd.f32 1e-05, %v1664_v28 }
 0xe2e   :  { %v1663_v30 = vpop.xlane.xlu0 %1662 }
 0xe2f   :  { %2235 = vrsqrt.f32 %v1666_v29  ;;  %v1665_v31 = vmul.f32 0.03125, %v1663_v30 }
 0xe31   :  { %v1667_v32 = vadd.f32 1e-05, %v1665_v31 }
 0xe33   :  { %2237 = vrsqrt.f32 %v1667_v32 }
 0xe39   :  { %v2236_v33 = vpop.eup %2235 }
 0xe3a   :  { %v1670_v34 = vmul.f32 %v2236_v33, %v1654_v1 }
 0xe3c   :  { %v1678_v37 = vmul.f32 %v1940_v39, %v1670_v34 }
 0xe3d   :  { %v2238_v38 = vpop.eup %2237 }
 0xe3e   :  { %v1671_v40 = vmul.f32 %v2238_v38, %v1655_v18  ;;  %v1686_v42 = vadd.f32 %v1941_v35, %v1678_v37 }
 0xe40   :  { %v1679_v43 = vmul.f32 %v1940_v39, %v1671_v40  ;;  %2118 = vmatprep.mubr.msk.f32.mxu1 %vm63_vm0, %v1686_v42 }
 0xe42   :  { %v1687_v44 = vadd.f32 %v1941_v35, %v1679_v43 }
 0xe44   :  { %2119 = vmatmul.mubr.msk.f32.vlgmr.msra.gmra.mrb[20].mxu1 %vm63_vm0, %v1687_v44 }
 0xf17   :  { %v2120_v57 = vpop.f32.mrb[20].mxu1 }
 0xf18   :  { %v1777_v58 = vadd.f32 %v2120_v57, %v1942_v56  ;;  %v1771_v59 = vpop.f32.mrb[21].mxu1 }
 0xf19   :  { %v1772_v60 = vadd.f32 %v1942_v56, %v1771_v59 }
 0xf1a   :  { %v1783_v61 = vmul.f32 0.70710677, %v1777_v58  ;;  %v1781_v10 = vmul.f32 0.5, %v1777_v58 }
 0xf1b   :  { %v1782_v62 = vmul.f32 0.70710677, %v1772_v60  ;;  %v1780_v4 = vmul.f32 0.5, %v1772_v60 }
 0xf1c   :  { %2239 = verf.f32 %v1783_v61 }
 0xf1d   :  { %2241 = verf.f32 %v1782_v62 }
 0xf26   :  { %v2240_v63 = vpop.eup %2239 }
 0xf27   :  { %v2242_v2 = vpop.eup %2241  ;;  %v1787_v3 = vadd.f32 1.0, %v2240_v63 }
 0xf28   :  { %v1786_v5 = vadd.f32 1.0, %v2242_v2 }
 0xf29   :  { %v1789_v7 = vmul.f32 %v1787_v3, %v1781_v10 }
 0xf2a   :  { %v1788_v6 = vmul.f32 %v1786_v5, %v1780_v4 }
 0xf2c   :  { %2137 = vmatprep.mubr.msk.f32.mxu0 %vm1805_vm5, %v1788_v6 }
 0xf2d   :  { %2138 = vmatmul.mubr.msk.f32.vlgmr.msra.gmra.mrb[16].mxu0 %vm1805_vm5, %v1789_v7 }
0x1000   :  { %v2139_v12 = vpop.f32.mrb[16].mxu0 }
0x1001   :  { %v1884_v13 = vadd.f32 %v2139_v12, %v1945_v8  ;;  %v1878_v14 = vpop.f32.mrb[17].mxu0 }
0x1002   :  { %v1879_v15 = vadd.f32 %v1945_v8, %v1878_v14 }
0x1003   :  { %v1888_v16 = vadd.f32 %v1884_v13, %v2580_v9 }
0x1004   :  { %v1887_v17 = vadd.f32 %v1879_v15, %v2583_v11 }
0x1005   :  { %1890 = vst.msk [vmem:[#allocation5 + $0x8] sm:$0xff] %vm63_vm0, %v1888_v16 }
0x1006   :  { %1889 = vst.msk [vmem:[#allocation5] sm:$0xff] %vm63_vm0, %v1887_v17 }
0x1007   :  { %2276 = shalt.err (!%p2273_p12)
}
0x1008   :  { %s2277_s25 = scalar_lea.hbm %s2675_s13, 256 }
0x1009   :  { %p2278_p13 = scmp.ne.s32.totalorder %s2675_s13, %s2277_s25  ;;  %p2281_p0 = scmp.lt.u32.totalorder %s2277_s25, %s2675_s13 }
0x100b   :  { %p2283_p1 = pnand %p2281_p0, %p2278_p13 }
0x100d   :  { %2286 = shalt.err (!%p2283_p1)
}
0x100e   :  { %1902 = dma.vmem_to_hbm [thread:$0]  %s1897_s22, 256, %s2675_s13, [#allocation4], %s2292_s18, %s2292_s18, %s2293_s19  }
0x100f   :  { %2289 = dma.done.wait [#allocation4], 256  }
0x1010   :  { %2290 = vsyncadd [#allocation4], 4294967040 }
0x1011   :  { %1906 = vsyncpa [#allocation3], 1 }
0x1012   :  { %1907 = vsyncpa [#allocation4], 1 }

</bundles_post_ra>
